<compile_context>
chip_gen: v7x
topology: tpu7x:2x2x1
jax: 0.10.0
libtpu: 0.0.40
codegen_flags: <defaults>
</compile_context>

<pallas_src>
import functools
import math

import jax
import jax.numpy as jnp
from jax.experimental import pallas as pl
from jax.experimental.pallas import tpu as pltpu

_MIB = 1024 * 1024


def _vmem_limit_bytes():
    """Generation-aware VMEM limit: ~48 MiB on v7x (64 MiB/TC), 64 MiB on v5e/v6e (128 MiB)."""
    cap = None
    try:
        cap = getattr(pltpu.get_tpu_info(), "vmem_capacity_bytes", None)
    except Exception:
        cap = None
    if not cap:
        cap = 64 * _MIB  # conservative default (v7x per-core capacity)
    return int(min(cap - 16 * _MIB, 64 * _MIB))


def _divisor_tile(dim, cap, align):
    """Largest divisor of `dim` <= cap (full dim if it already fits), preferring
    `align`-aligned tiles so blocks satisfy the TPU (8, 128) layout rules."""
    if dim <= cap:
        return dim
    divs = [t for t in range(1, cap + 1) if dim % t == 0]
    good = [t for t in divs if t % align == 0]
    return max(good) if good else max(divs)


# ----------------------------- linear (Conv1D) kernels -----------------------------

def _linear_fullk_kernel(x_ref, w_ref, b_ref, o_ref):
    # bf16 MXU inputs + f32 accumulation; bias added once, output written exactly once.
    acc = jnp.dot(x_ref[...].astype(jnp.bfloat16), w_ref[...].astype(jnp.bfloat16),
                  preferred_element_type=jnp.float32)
    o_ref[...] = (acc + b_ref[...].astype(jnp.float32)).astype(o_ref.dtype)


def _linear_ktiled_kernel(x_ref, w_ref, b_ref, o_ref, acc_ref):
    # Fallback for very large K: tiled reduction with an f32 VMEM accumulator.
    k = pl.program_id(2)

    @pl.when(k == 0)
    def _init():
        acc_ref[...] = jnp.zeros_like(acc_ref)

    acc_ref[...] += jnp.dot(x_ref[...].astype(jnp.bfloat16), w_ref[...].astype(jnp.bfloat16),
                            preferred_element_type=jnp.float32)

    @pl.when(k == pl.num_programs(2) - 1)
    def _finalize():
        o_ref[...] = (acc_ref[...] + b_ref[...].astype(jnp.float32)).astype(o_ref.dtype)


def linear(x2d, w, b, *, vmem_limit):
    """GPT-2 Conv1D: x @ W + b with W [in, out]."""
    M, K = x2d.shape
    _, N = w.shape
    budget = vmem_limit // 2
    tm = _divisor_tile(M, 512, align=8)     # larger tm -> fewer weight re-reads from HBM
    tn = _divisor_tile(N, 256, align=128)
    b2 = b.reshape(1, N)

    cost = pl.CostEstimate(
        flops=2 * M * N * K, transcendentals=0,
        bytes_accessed=(M * K + K * N + N + M * N) * x2d.dtype.itemsize)

    def cparams(sems):
        return pltpu.CompilerParams(dimension_semantics=sems, vmem_limit_bytes=vmem_limit)

    # Single full-K reduction step whenever the double-buffered tiles fit VMEM:
    # no k grid axis, no accumulator scratch, no init/finalize phases.
    if 2 * 4 * (tm * K + K * tn + tm * tn) <= budget:
        return pl.pallas_call(
            _linear_fullk_kernel,
            out_shape=jax.ShapeDtypeStruct((M, N), x2d.dtype),
            grid=(M // tm, N // tn),
            in_specs=[
                pl.BlockSpec((tm, K), lambda i, j: (i, 0)),
                pl.BlockSpec((K, tn), lambda i, j: (0, j)),
                pl.BlockSpec((1, tn), lambda i, j: (0, j)),
            ],
            out_specs=pl.BlockSpec((tm, tn), lambda i, j: (i, j)),
            compiler_params=cparams(("parallel", "parallel")),
            cost_estimate=cost,
        )(x2d, w, b2)

    tk = _divisor_tile(K, 512, align=128)
    return pl.pallas_call(
        _linear_ktiled_kernel,
        out_shape=jax.ShapeDtypeStruct((M, N), x2d.dtype),
        grid=(M // tm, N // tn, K // tk),
        in_specs=[
            pl.BlockSpec((tm, tk), lambda i, j, k: (i, k)),
            pl.BlockSpec((tk, tn), lambda i, j, k: (k, j)),
            pl.BlockSpec((1, tn), lambda i, j, k: (0, j)),
        ],
        out_specs=pl.BlockSpec((tm, tn), lambda i, j, k: (i, j)),
        scratch_shapes=[pltpu.VMEM((tm, tn), jnp.float32)],
        compiler_params=cparams(("parallel", "parallel", "arbitrary")),
        cost_estimate=cost,
    )(x2d, w, b2)


# ----------------------------- attention kernel -----------------------------

def _attn_kernel(q_ref, k_ref, v_ref, ov_ref, mk_ref, o_ref, w_out_ref, *, ol, scale):
    qi = pl.program_id(1)
    q = q_ref[0, 0].astype(jnp.float32) * scale  # fold 1/sqrt(hd) into the small [tq, hd] tile
    k = k_ref[0, 0]
    v = v_ref[0, 0]
    tq, S = q.shape[0], k.shape[0]

    # q @ k^T expressed directly (no XLU transpose); bf16 MXU inputs, f32 accumulation.
    w = jax.lax.dot_general(
        q.astype(jnp.bfloat16), k.astype(jnp.bfloat16),
        dimension_numbers=(((1,), (1,)), ((), ())),
        preferred_element_type=jnp.float32)

    # causal bias (nd == ns, no past): masked entries become exactly -10000.0,
    # equivalent to w*b - 10000*(1-b) with b = lower-triangular.
    rows = jax.lax.broadcasted_iota(jnp.int32, (tq, S), 0) + qi * tq
    cols = jax.lax.broadcasted_iota(jnp.int32, (tq, S), 1)
    w = jnp.where(cols <= rows, w, -10000.0)

    # softmax; EUP approx reciprocal + one Newton step -> near-exact attention weights.
    w = w - jnp.max(w, axis=-1, keepdims=True)
    w = jnp.exp(w)
    denom = jnp.sum(w, axis=-1, keepdims=True)
    r = pl.reciprocal(denom, approx=True)
    r = r * (2.0 - denom * r)
    w = w * r

    # TODO(synk): attn_dropout omitted (eval-mode identity).

    # Attention-weight override.  ov/mk carry only ceil(ol/tq)*tq rows (block index clamped
    # in the BlockSpec); the static row bound discards clamped / padded rows.
    apply = mk_ref[0] != 0
    if ol < S:
        apply = apply & (rows < ol)
    w = jnp.where(apply, ov_ref[0].astype(jnp.float32), w)

    o_ref[0, 0] = jnp.dot(w.astype(jnp.bfloat16), v.astype(jnp.bfloat16),
                          preferred_element_type=jnp.float32).astype(o_ref.dtype)
    w_out_ref[0, 0] = w.astype(w_out_ref.dtype)


def _attn_q_tile(S, hd, vmem_limit):
    """Largest q tile (<=512) dividing S whose double-buffered working set fits VMEM
    (on v7x's smaller VMEM this caps at 128 for long sequences)."""
    budget = vmem_limit // 2

    def est(t):
        blk = 2 * (2 * t * hd * 4            # q tile + a tile (f32), double-buffered
                   + 2 * S * hd * 4          # full k + v tiles (f32)
                   + t * S * (2 + 1 + 2))    # override (bf16) + mask (int8) + w_out (bf16)
        return blk + 6 * t * S * 4           # in-kernel f32 [t, S] temporaries

    divs = [t for t in range(1, min(S, 512) + 1) if S % t == 0]
    ok = [t for t in divs if est(t) <= budget]
    if not ok:
        return divs[0]
    aligned = [t for t in ok if t % 8 == 0 or t == S]
    return max(aligned) if aligned else max(ok)


# ----------------------------- full forward -----------------------------

def attention_override_forward(x, params, attn_override, attn_override_mask, n_head):
    """Returns (a, present, attn_weights) matching the PyTorch module
    (output_attentions=True, layer_past=None, attention_mask=None, head_mask=None)."""
    B, S, D = x.shape
    hd = D // n_head
    vlim = _vmem_limit_bytes()

    # c_attn projection, then one transpose to [3, B, H, S, hd] (instead of split + 3 transposes)
    qkv = linear(x.reshape(B * S, D), params["c_attn_w"], params["c_attn_b"], vmem_limit=vlim)
    qkv = qkv.reshape(B, S, 3, n_head, hd).transpose(2, 0, 3, 1, 4)
    q, k, v = qkv[0], qkv[1], qkv[2]

    # present = stack((key.transpose(-2,-1), value)); key was [B,H,hd,S] in torch,
    # transposed back it is [B,H,S,hd] -> identical to our k layout.
    present = jnp.stack([k, v])  # [2, B, H, S, hd]

    tq = _attn_q_tile(S, hd, vlim)
    n_q = S // tq

    # Override / mask streams: bf16 values + int8 mask, rows padded only to a q-tile multiple
    # (never to the full S x S square the torch module never touches).
    ol = int(attn_override_mask.shape[-1])
    ol_r = max(tq, ((ol + tq - 1) // tq) * tq)
    if ol == S and ol_r == S:
        ov = attn_override.astype(jnp.bfloat16)
        mk = attn_override_mask.astype(jnp.int8)
    else:
        ov = jnp.zeros((n_head, ol_r, S), jnp.bfloat16)
        ov = ov.at[:, :ol, :ol].set(attn_override.astype(jnp.bfloat16))
        mk = jnp.zeros((n_head, ol_r, S), jnp.int8)
        mk = mk.at[:, :ol, :ol].set(attn_override_mask.astype(jnp.int8))
    n_ov_q = ol_r // tq
    ov_idx = lambda h, qi, b: (h, jnp.minimum(qi, n_ov_q - 1), 0)

    cost = pl.CostEstimate(
        flops=4 * B * n_head * S * S * hd,
        transcendentals=B * n_head * S * (S + 1),
        bytes_accessed=(4 * 3 * B * n_head * S * hd     # q, k, v (f32)
                        + 3 * n_head * ol_r * S         # override (bf16) + mask (int8)
                        + 4 * B * n_head * S * hd       # attention output a (f32)
                        + 2 * B * n_head * S * S))      # attention weights (bf16)

    kernel = functools.partial(_attn_kernel, ol=ol, scale=1.0 / math.sqrt(hd))

    a, attn_w = pl.pallas_call(
        kernel,
        out_shape=(
            jax.ShapeDtypeStruct((B, n_head, S, hd), x.dtype),
            # bf16 halves the dominant [B, H, S, S] HBM write (and v5e vector-store pressure)
            jax.ShapeDtypeStruct((B, n_head, S, S), jnp.bfloat16),
        ),
        # batch innermost + "arbitrary": override/mask blocks (indexed by (h, qi) only) stay
        # VMEM-resident across it, and v7x megacore shards over heads rather than batch.
        grid=(n_head, n_q, B),
        in_specs=[
            pl.BlockSpec((1, 1, tq, hd), lambda h, qi, b: (b, h, qi, 0)),  # q tile
            pl.BlockSpec((1, 1, S, hd), lambda h, qi, b: (b, h, 0, 0)),    # k (full)
            pl.BlockSpec((1, 1, S, hd), lambda h, qi, b: (b, h, 0, 0)),    # v (full)
            pl.BlockSpec((1, tq, S), ov_idx),                              # override (bf16)
            pl.BlockSpec((1, tq, S), ov_idx),                              # mask (int8)
        ],
        out_specs=(
            pl.BlockSpec((1, 1, tq, hd), lambda h, qi, b: (b, h, qi, 0)),
            pl.BlockSpec((1, 1, tq, S), lambda h, qi, b: (b, h, qi, 0)),
        ),
        compiler_params=pltpu.CompilerParams(
            dimension_semantics=("parallel", "parallel", "arbitrary"),
            vmem_limit_bytes=vlim,
        ),
        cost_estimate=cost,
    )(q, k, v, ov, mk)

    # TODO(synk): causal kv-tile skipping not implemented — the post-softmax override does not
    # commute with online-softmax rescaling, so it would need a two-pass restructuring.

    # merge heads + c_proj
    a = a.transpose(0, 2, 1, 3).reshape(B * S, D)
    out = linear(a, params["c_proj_w"], params["c_proj_b"], vmem_limit=vlim).reshape(B, S, D)
    # TODO(synk): resid_dropout omitted (eval-mode identity).
    return out, present, attn_w


# ----------------------------- pure-JAX reference -----------------------------

def reference_forward(x, params, attn_override, attn_override_mask, n_head):
    B, S, D = x.shape
    hd = D // n_head
    qkv = x.reshape(B * S, D) @ params["c_attn_w"] + params["c_attn_b"]
    qkv = qkv.reshape(B, S, 3 * D)
    q, k, v = jnp.split(qkv, 3, axis=-1)
    sh = lambda t: t.reshape(B, S, n_head, hd).transpose(0, 2, 1, 3)
    q, k, v = sh(q), sh(k), sh(v)
    w = jnp.einsum("bhqd,bhkd->bhqk", q, k) / math.sqrt(hd)
    causal = jnp.tril(jnp.ones((S, S), jnp.float32))
    w = w * causal - 10000.0 * (1.0 - causal)
    w = jax.nn.softmax(w, axis=-1)
    ol = attn_override_mask.shape[-1]
    w = w.at[:, :, :ol, :ol].set(
        jnp.where(attn_override_mask, attn_override, w[:, :, :ol, :ol]))
    a = jnp.einsum("bhqk,bhkd->bhqd", w, v)
    a = a.transpose(0, 2, 1, 3).reshape(B, S, D)
    out = a.reshape(B * S, D) @ params["c_proj_w"] + params["c_proj_b"]
    return out.reshape(B, S, D), jnp.stack([k, v]), w


# ----------------------------- main -----------------------------

if __name__ == "__main__":
    B, S, D, H = 2, 8, 32, 4  # batch, seq, hidden, heads

    key = jax.random.PRNGKey(0)
    k_x, k_w1, k_b1, k_w2, k_b2, k_ov, k_mk = jax.random.split(key, 7)

    x = jax.random.normal(k_x, (B, S, D), jnp.float32)
    params = {
        "c_attn_w": 0.02 * jax.random.normal(k_w1, (D, 3 * D), jnp.float32),
        "c_attn_b": 0.01 * jax.random.normal(k_b1, (3 * D,), jnp.float32),
        "c_proj_w": 0.02 * jax.random.normal(k_w2, (D, D), jnp.float32),
        "c_proj_b": 0.01 * jax.random.normal(k_b2, (D,), jnp.float32),
    }
    attn_override = jax.random.uniform(k_ov, (H, S, S), jnp.float32)
    attn_override_mask = jax.random.bernoulli(k_mk, 0.3, (H, S, S))

    out, present, attn_w = attention_override_forward(
        x, params, attn_override, attn_override_mask, H
    )
    jax.block_until_ready((out, present, attn_w))

    ref_out, ref_present, ref_w = reference_forward(
        x, params, attn_override, attn_override_mask, H
    )

    # bf16 MXU inputs (f32 accumulation) and the bf16 attention-weight output bound the
    # deviation from the f32 reference to ~1e-3; the softmax itself is Newton-refined.
    assert jnp.allclose(out, ref_out, atol=2e-3, rtol=2e-3)
    assert jnp.allclose(attn_w.astype(jnp.float32), ref_w, atol=2e-3, rtol=2e-3)
    assert jnp.allclose(present, ref_present, atol=2e-3, rtol=2e-3)

    print("KERNEL_OK")
</pallas_src>

<mosaic_0001>
module attributes {stable_mosaic.version = 11 : i64} {
  func.func @_linear_fullk_kernel(%arg0: i32, %arg1: i32, %arg2: memref<16x32xf32, #tpu.memory_space<vmem>>, %arg3: memref<32x96xf32, #tpu.memory_space<vmem>>, %arg4: memref<1x96xf32, #tpu.memory_space<vmem>>, %arg5: memref<16x96xf32, #tpu.memory_space<vmem>>) attributes {dimension_semantics = [#tpu.dimension_semantics<parallel>, #tpu.dimension_semantics<parallel>], iteration_bounds = array<i64: 1, 1>, scalar_prefetch = 0 : i64, scratch_operands = 0 : i64, tpu.core_type = #tpu.core_type<tc>, window_params = [{transform_indices = @transform_0, window_bounds = array<i64: 16, 32>}, {transform_indices = @transform_1, window_bounds = array<i64: 32, 96>}, {transform_indices = @transform_2, window_bounds = array<i64: 1, 96>}, {transform_indices = @transform_3, window_bounds = array<i64: 16, 96>}]} {
    %c0 = arith.constant 0 : index
    %c0_0 = arith.constant 0 : index
    %0 = vector.load %arg2[%c0, %c0_0] : memref<16x32xf32, #tpu.memory_space<vmem>>, vector<16x32xf32>
    %1 = arith.truncf %0 : vector<16x32xf32> to vector<16x32xbf16>
    %c0_1 = arith.constant 0 : index
    %c0_2 = arith.constant 0 : index
    %2 = vector.load %arg3[%c0_1, %c0_2] : memref<32x96xf32, #tpu.memory_space<vmem>>, vector<32x96xf32>
    %3 = arith.truncf %2 : vector<32x96xf32> to vector<32x96xbf16>
    %cst = arith.constant dense<0.000000e+00> : vector<16x96xf32>
    %4 = tpu.matmul %1, %3, %cst {dimension_numbers = #tpu.dot_dimension_numbers<[1], [0], [0], [1], [0, 0, 1, 1], [], []>} : vector<16x32xbf16>, vector<32x96xbf16>, vector<16x96xf32> -> vector<16x96xf32>
    %c0_3 = arith.constant 0 : index
    %c0_4 = arith.constant 0 : index
    %5 = vector.load %arg4[%c0_3, %c0_4] : memref<1x96xf32, #tpu.memory_space<vmem>>, vector<1x96xf32>
    %6 = vector.broadcast %5 : vector<1x96xf32> to vector<16x96xf32>
    %7 = arith.addf %4, %6 : vector<16x96xf32>
    %c0_5 = arith.constant 0 : index
    %c0_6 = arith.constant 0 : index
    %8 = vector.load %arg5[%c0_5, %c0_6] : memref<16x96xf32, #tpu.memory_space<vmem>>, vector<16x96xf32>
    tpu.vector_store %arg5[%c0_5, %c0_6], %7 {strides = array<i32>} : memref<16x96xf32, #tpu.memory_space<vmem>>, vector<16x96xf32>,
    return
  }
  func.func @transform_0(%arg0: i32, %arg1: i32) -> (i32, i32) {
    %c0_i32 = arith.constant 0 : i32
    %c0_i32_0 = arith.constant 0 : i32
    return %arg0, %c0_i32 : i32, i32
  }
  func.func @transform_1(%arg0: i32, %arg1: i32) -> (i32, i32) {
    %c0_i32 = arith.constant 0 : i32
    %c0_i32_0 = arith.constant 0 : i32
    return %c0_i32, %arg1 : i32, i32
  }
  func.func @transform_2(%arg0: i32, %arg1: i32) -> (i32, i32) {
    %c0_i32 = arith.constant 0 : i32
    %c0_i32_0 = arith.constant 0 : i32
    return %c0_i32, %arg1 : i32, i32
  }
  func.func @transform_3(%arg0: i32, %arg1: i32) -> (i32, i32) {
    %c0_i32 = arith.constant 0 : i32
    return %arg0, %arg1 : i32, i32
  }
}

</mosaic_0001>

<bundles_post_ra>
// kernel: tpu_custom_call.1
= control target key start
LH: loop header
LB: loop body
LE: loop exit
PB: predicated region body
PF: predicated region fallthrough
CT: control target
= control target key end

     0   :  { %8 = vsyncpa [#allocation3], 0  ;;  %s293_s0 = inlined_call_operand.hbm [shape: f32[16,32], index: 0, kind: input, shape index: {}]   ;;  %s294_s1 = inlined_call_operand.hbm [shape: f32[32,96], index: 1, kind: input, shape index: {}]   ;;  %s295_s2 = inlined_call_operand.vmem [shape: f32[1,96], index: 2, kind: input, shape index: {}]   ;;  %s296_s3 = inlined_call_operand.hbm [shape: f32[16,96], index: 3, kind: output, shape index: {}]  }
   0x1   :  { %9 = vsyncpa [#allocation6], 0 }
   0x2   :  { %10 = vsyncpa [#allocation4], 0  ;;  %s218_s12 = smov [#allocation2]   ;;  %s146_s16 = scalar_lea.hbm %s293_s0, 256 }
   0x3   :  { %s16_s13 = sshll.u32 %s218_s12, 4  ;;  %p147_p0 = scmp.ne.s32.totalorder %s293_s0, %s146_s16  ;;  %s17_s13 = int_to_ptr.vmem [resolvable:$true] %s16_s13 }
   0x4   :  { %p150_p1 = scmp.lt.u32.totalorder %s146_s16, %s293_s0 }
   0x6   :  { %p152_p2 = pnand %p150_p1, %p147_p0 }
   0x8   :  { %155 = shalt.err (!%p152_p2)
}
   0x9   :  { %s156_s21 = scalar_lea.vmem %s17_s13, 256  ;;  %p161_p4 = scmp.lt.s32.totalorder %s17_s13, %s17_s13 }
   0xa   :  { %p157_p3 = scmp.ne.s32.totalorder %s17_s13, %s156_s21  ;;  %p162_p5 = scmp.lt.s32.totalorder %s156_s21, %s156_s21 }
   0xc   :  { %p163_p6 = por %p162_p5, %p161_p4 }
   0xe   :  { %p164_p7 = pnand %p163_p6, %p157_p3 }
  0x10   :  { %167 = shalt.err (!%p164_p7)
}
  0x11   :  { %s219_s22 = smov 128   ;;  %s220_s23 = smov 8  }
  0x12   :  { %22 = dma.hbm_to_vmem [thread:$0]  %s293_s0, 256, %s17_s13, [#allocation3], %s219_s22, %s219_s22, %s220_s23  }
  0x13   :  { %s221_s26 = smov [#allocation5]   ;;  %s168_s30 = scalar_lea.hbm %s294_s1, 512 }
  0x14   :  { %s28_s27 = sshll.u32 %s221_s26, 4  ;;  %p169_p8 = scmp.ne.s32.totalorder %s294_s1, %s168_s30  ;;  %s29_s27 = int_to_ptr.vmem [resolvable:$true] %s28_s27 }
  0x15   :  { %p172_p9 = scmp.lt.u32.totalorder %s168_s30, %s294_s1 }
  0x17   :  { %p174_p10 = pnand %p172_p9, %p169_p8 }
  0x19   :  { %177 = shalt.err (!%p174_p10)
}
  0x1a   :  { %s178_s8 = scalar_lea.vmem %s29_s27, 512  ;;  %p183_p12 = scmp.lt.s32.totalorder %s29_s27, %s29_s27 }
  0x1b   :  { %p179_p11 = scmp.ne.s32.totalorder %s29_s27, %s178_s8  ;;  %p184_p13 = scmp.lt.s32.totalorder %s178_s8, %s178_s8 }
  0x1d   :  { %p185_p0 = por %p184_p13, %p183_p12 }
  0x1f   :  { %p186_p1 = pnand %p185_p0, %p179_p11 }
  0x21   :  { %189 = shalt.err (!%p186_p1)
}
  0x22   :  { %34 = dma.hbm_to_vmem [thread:$0]  %s294_s1, 512, %s29_s27, [#allocation6], %s219_s22, %s219_s22, %s220_s23  }
  0x23   :  { %212 = dma.done.wait [#allocation3], 256  }
  0x24   :  { %213 = vsyncadd [#allocation3], 4294967040 }
  0x25   :  { %214 = dma.done.wait [#allocation6], 512  }
  0x26   :  { %215 = vsyncadd [#allocation6], 4294966784  ;;  %v222_v0 = vmov 0.0   ;;  %vm223_vm0 = vmmov 0   ;;  %v47_v1 = vld [vmem:[#allocation5] sm:$0xff]  ;;  %v48_v2 = vld [vmem:[#allocation5 + $0x8] sm:$0xff] }
  0x27   :  { %131 = vmatprep.subr.bf16.mxu0 %v222_v0  ;;  %135 = vmatprep.mubr.msk.bf16.mxu0 %vm223_vm0, %v222_v0  ;;  %v49_v3 = vld [vmem:[#allocation5 + $0x10] sm:$0xff]  ;;  %v51_v4 = vpack.c.bf16 %v48_v2, %v47_v1  ;;  %v50_v5 = vld [vmem:[#allocation5 + $0x18] sm:$0xff]  ;;  %vm60_vm1 = vcmask 261120   ;;  %vm105_vm2 = vcmask 785408   ;;  %s224_s11 = smov [#allocation7]  }
  0x28   :  { %v52_v6 = vpack.c.bf16 %v50_v5, %v49_v3  ;;  %v44_v7 = vld [vmem:[#allocation2] sm:$0xff]  ;;  %v45_v8 = vld [vmem:[#allocation2 + $0x8] sm:$0xff]  ;;  %s113_s12 = sshll.u32 %s224_s11, 4  ;;  %s114_s12 = int_to_ptr.vmem [resolvable:$true] %s113_s12 }
  0x29   :  { %132 = vmatpush3.bf16.msra.mxu0 %v51_v4  ;;  %v46_v9 = vpack.c.bf16 %v45_v8, %v44_v7  ;;  %v126_v10 = vld [vmem:[%s295_s2] ss:$0 sm:$0xff]  ;;  %s190_s13 = scalar_lea.vmem %s114_s12, 256  ;;  %p195_p3 = scmp.lt.s32.totalorder %s114_s12, %s114_s12 }
  0x2a   :  { %133 = vmatprep.subr.bf16.mxu0 %v222_v0  ;;  %p191_p2 = scmp.ne.s32.totalorder %s114_s12, %s190_s13  ;;  %p196_p4 = scmp.lt.s32.totalorder %s190_s13, %s190_s13 }
  0x2c   :  { %p197_p5 = por %p196_p4, %p195_p3 }
  0x2d   :  { %134 = vmatpush3.bf16.msra.mxu0 %v52_v6 }
  0x2e   :  { %p198_p6 = pnand %p197_p5, %p191_p2 }
  0x30   :  { %136 = vmatmul.mubr.msk.bf16.vlgmr.msra.gmra.mrb[0].mxu0 %vm60_vm1, %v46_v9 }
 0x103   :  { %v98_v11 = vpop.f32.mrb[0].mxu0 }
 0x104   :  { %v99_v12 = vadd.f32 %v126_v10, %v98_v11  ;;  %v137_v13 = vpop.f32.mrb[1].mxu0 }
 0x105   :  { %v101_v14 = vpop.f32.mrb[2].mxu0 }
 0x106   :  { %v102_v15 = vadd.f32 %v126_v10, %v101_v14  ;;  %v138_v16 = vpop.f32.mrb[3].mxu0  ;;  %106 = vst.msk [vmem:[#allocation7] sm:$0xff] %vm105_vm2, %v99_v12 }
 0x108   :  { %107 = vst.msk [vmem:[#allocation7 + $0x8] sm:$0xff] %vm105_vm2, %v102_v15 }
 0x109   :  { %201 = shalt.err (!%p198_p6)
}
 0x10a   :  { %s202_s15 = scalar_lea.hbm %s296_s3, 256 }
 0x10b   :  { %p203_p7 = scmp.ne.s32.totalorder %s296_s3, %s202_s15  ;;  %p206_p8 = scmp.lt.u32.totalorder %s202_s15, %s296_s3 }
 0x10d   :  { %p208_p9 = pnand %p206_p8, %p203_p7 }
 0x10f   :  { %211 = shalt.err (!%p208_p9)
}
 0x110   :  { %119 = dma.vmem_to_hbm [thread:$0]  %s114_s12, 256, %s296_s3, [#allocation4], %s219_s22, %s219_s22, %s220_s23  }
 0x111   :  { %216 = dma.done.wait [#allocation4], 256  }
 0x112   :  { %217 = vsyncadd [#allocation4], 4294967040 }
 0x113   :  { %123 = vsyncpa [#allocation3], 1 }
 0x114   :  { %124 = vsyncpa [#allocation6], 1 }
 0x115   :  { %125 = vsyncpa [#allocation4], 1 }

</bundles_post_ra>
